<compile_context>
chip_gen: v7x
topology: tpu7x:2x2x1
jax: 0.10.0
libtpu: 0.0.40
codegen_flags: <defaults>
</compile_context>

<pallas_src>
import jax
import jax.numpy as jnp
from jax.experimental import pallas as pl
from jax.experimental.pallas import tpu as pltpu


def mamba_seq_kernel(x_ref, ev_ref, h0_ref, w_ref, rows_ref, y_ref, h_ref):
    """One grid step == one timestep of the recurrence.

    x_ref   : (B, D_in)   per-step input slice (leading T squeezed)
    ev_ref  : (B, 1)      per-step event slice
    h0_ref  : (B, H)      initial hidden state (resident, read at t == 0)
    w_ref   : (H+D_in, H) stacked [a ; Wc^T] weights (resident)
    rows_ref: (4, H)      packed rows: [b ; bc ; Wout_row ; bout(broadcast)]
    y_ref   : (B, T)      lane-dense output slab (resident accumulator)
    h_ref   : (B, H)      hidden-state carry == final h_next output
    """
    t = pl.program_id(0)
    H = h0_ref.shape[1]

    @pl.when(t == 0)
    def _init():
        h_ref[...] = h0_ref[...]
        y_ref[...] = jnp.zeros_like(y_ref)

    x = x_ref[...]                                # (B, D_in)
    ev = ev_ref[...]                              # (B, 1)
    h = h_ref[...]                                # (B, H) carried state

    a_w = w_ref[0:H, :]                           # (H, H)
    wc_t = w_ref[H:, :]                           # (D_in, H)
    b_row = rows_ref[0:1, :]                      # (1, H)
    bc_row = rows_ref[1:2, :]                     # (1, H)
    wout_row = rows_ref[2:3, :]                   # (1, H)
    bout = rows_ref[3:4, 0:1]                     # (1, 1)

    # h @ a  and  c(x) = x @ Wc^T + bc   (MXU, f32 accumulate)
    h_a = jnp.dot(h, a_w, preferred_element_type=jnp.float32)
    cx = jnp.dot(x, wc_t, preferred_element_type=jnp.float32) + bc_row

    h_next = h_a + b_row * ev + cx
    # dropout(p=0.2): identity in eval/inference mode.
    # TODO(synk): training-mode dropout would need pltpu.prng_seed +
    #             pltpu.stateful_bernoulli.

    # fc_output with N=1: VPU multiply + lane reduction instead of an MXU
    # matmul that would use <1% of the systolic array output width.
    logit = jnp.sum(h_next * wout_row, axis=-1, keepdims=True) + bout   # (B, 1)
    y_col = jax.nn.sigmoid(logit)                                       # (B, 1)

    # carry the state; the HBM writeback of h_ref happens once, after the
    # last grid step (constant output index map).
    h_ref[...] = h_next

    # scatter this step's column into the lane-dense (B, T) output slab via a
    # VPU select (no dynamic lane indexing, no per-step HBM store).
    B, T = y_ref.shape
    lane = jax.lax.broadcasted_iota(jnp.int32, (B, T), 1)
    y_ref[...] = jnp.where(lane == t, y_col, y_ref[...])


def mamba_sequence_forward(x_seq, h0, event_seq, packed):
    """Run the recurrence for a whole sequence in ONE pallas_call.

    x_seq: (T, B, D_in), h0: (B, H), event_seq: (T, B)
    returns y_seq: (B, T) sigmoid outputs, h_last: (B, H) final hidden state.
    """
    T, B, D_in = x_seq.shape
    H = h0.shape[1]
    ev3 = event_seq.reshape(T, B, 1).astype(jnp.float32)
    w_stack = packed["w_stack"]                  # (H + D_in, H)
    rows = packed["rows"]                        # (4, H)
    kh = H + D_in

    y_seq, h_last = pl.pallas_call(
        mamba_seq_kernel,
        out_shape=(jax.ShapeDtypeStruct((B, T), jnp.float32),
                   jax.ShapeDtypeStruct((B, H), jnp.float32)),
        grid=(T,),
        in_specs=[
            pl.BlockSpec((None, B, D_in), lambda t: (t, 0, 0)),  # x step slice
            pl.BlockSpec((None, B, 1),    lambda t: (t, 0, 0)),  # event step slice
            pl.BlockSpec((B, H),          lambda t: (0, 0)),     # h0 (resident)
            pl.BlockSpec((kh, H),         lambda t: (0, 0)),     # [a ; Wc^T] (resident)
            pl.BlockSpec((4, H),          lambda t: (0, 0)),     # packed rows (resident)
        ],
        out_specs=(
            pl.BlockSpec((B, T), lambda t: (0, 0)),              # lane-dense y slab
            pl.BlockSpec((B, H), lambda t: (0, 0)),              # final hidden state
        ),
        compiler_params=pltpu.CompilerParams(
            dimension_semantics=("arbitrary",)),                 # sequential recurrence
    )(x_seq, ev3, h0, w_stack, rows)
    return y_seq, h_last


def mamba_forward(x, h, event, packed):
    """Single-step forward matching the PyTorch module exactly.

    x: (B, D_in), h: (B, H), event: (B,) -> (y_pred (B, 1), h_next (B, H))
    """
    B, D_in = x.shape
    y_seq, h_next = mamba_sequence_forward(
        x.reshape(1, B, D_in), h, event.reshape(1, B), packed)
    return y_seq, h_next  # y_seq is (B, 1) when T == 1


def init_params(key, input_dim, hidden_dim):
    ks = jax.random.split(key, 6)
    a = jax.random.uniform(ks[0], (hidden_dim, hidden_dim), jnp.float32)   # torch.rand
    b = jax.random.uniform(ks[1], (1, hidden_dim), jnp.float32)            # torch.rand
    # nn.Linear(input_dim, hidden_dim): weight (H, D_in), bias (H,)
    wc = jax.random.uniform(ks[2], (hidden_dim, input_dim), jnp.float32,
                            minval=-0.5, maxval=0.5)
    bc = jax.random.uniform(ks[3], (hidden_dim,), jnp.float32,
                            minval=-0.5, maxval=0.5)
    # nn.Linear(hidden_dim, 1): weight (1, H), bias (1,)
    wout = jax.random.uniform(ks[4], (1, hidden_dim), jnp.float32,
                              minval=-0.5, maxval=0.5)
    bout = jax.random.uniform(ks[5], (1,), jnp.float32, minval=-0.5, maxval=0.5)
    return {"a": a, "b": b, "wc": wc, "bc": bc, "wout": wout, "bout": bout}


def pack_params(params):
    """Collapse the 6 parameter tensors into 2 VMEM-resident slabs."""
    H = params["a"].shape[0]
    w_stack = jnp.concatenate([params["a"], params["wc"].T], axis=0)  # (H+D_in, H)
    rows = jnp.concatenate([
        params["b"],                                   # (1, H)
        params["bc"].reshape(1, H),                    # (1, H)
        params["wout"],                                # (1, H)
        jnp.full((1, H), params["bout"][0], jnp.float32),
    ], axis=0)                                         # (4, H)
    return {"w_stack": w_stack, "rows": rows}


# ---------------- pure-JAX references ----------------

def reference_step(x, h, event, params):
    event_effect = params["b"] * event[:, None]
    h_next = h @ params["a"] + event_effect + (x @ params["wc"].T + params["bc"])
    y = jax.nn.sigmoid(h_next @ params["wout"].T + params["bout"])
    return y, h_next


def reference_sequence(x_seq, h0, ev_seq, params):
    h = h0
    ys = []
    for t in range(x_seq.shape[0]):
        y, h = reference_step(x_seq[t], h, ev_seq[t], params)
        ys.append(y[:, 0])
    return jnp.stack(ys, axis=1), h        # (B, T), (B, H)


if __name__ == "__main__":
    B, D_IN, HIDDEN, T = 8, 16, 32, 8

    key = jax.random.PRNGKey(0)
    kp, kx, kh, ke = jax.random.split(key, 4)
    params = init_params(kp, D_IN, HIDDEN)
    packed = pack_params(params)

    x_seq = jax.random.normal(kx, (T, B, D_IN), jnp.float32)
    h0 = jax.random.normal(kh, (B, HIDDEN), jnp.float32)
    ev_seq = jax.random.normal(ke, (T, B), jnp.float32)

    # 1) single-step forward: exact PyTorch module semantics
    y1, h1 = mamba_forward(x_seq[0], h0, ev_seq[0], packed)
    jax.block_until_ready((y1, h1))
    y1_ref, h1_ref = reference_step(x_seq[0], h0, ev_seq[0], params)
    assert y1.shape == (B, 1) and h1.shape == (B, HIDDEN)
    assert jnp.allclose(y1, y1_ref, atol=1e-5, rtol=1e-5)
    assert jnp.allclose(h1, h1_ref, atol=1e-4, rtol=1e-4)

    # 2) optimized path: whole T-step recurrence in one kernel launch
    y_seq, h_last = mamba_sequence_forward(x_seq, h0, ev_seq, packed)
    jax.block_until_ready((y_seq, h_last))
    y_seq_ref, h_last_ref = reference_sequence(x_seq, h0, ev_seq, params)
    assert y_seq.shape == (B, T) and h_last.shape == (B, HIDDEN)
    assert jnp.allclose(y_seq, y_seq_ref, atol=1e-5, rtol=1e-5)
    assert jnp.allclose(h_last, h_last_ref, rtol=1e-4, atol=1e-4)

    print("KERNEL_OK")
</pallas_src>

<mosaic_0001>
module attributes {stable_mosaic.version = 11 : i64} {
  func.func @mamba_seq_kernel(%arg0: i32, %arg1: memref<1x8x16xf32, #tpu.memory_space<vmem>>, %arg2: memref<1x8x1xf32, #tpu.memory_space<vmem>>, %arg3: memref<8x32xf32, #tpu.memory_space<vmem>>, %arg4: memref<48x32xf32, #tpu.memory_space<vmem>>, %arg5: memref<4x32xf32, #tpu.memory_space<vmem>>, %arg6: memref<8x1xf32, #tpu.memory_space<vmem>>, %arg7: memref<8x32xf32, #tpu.memory_space<vmem>>) attributes {dimension_semantics = [#tpu.dimension_semantics<arbitrary>], iteration_bounds = array<i64: 1>, scalar_prefetch = 0 : i64, scratch_operands = 0 : i64, tpu.core_type = #tpu.core_type<tc>, window_params = [{transform_indices = @transform_0, window_bounds = array<i64: 1, 8, 16>}, {transform_indices = @transform_1, window_bounds = array<i64: 1, 8, 1>}, {pipeline_mode = #tpu.pipeline_mode<synchronous>, transform_indices = @transform_2, window_bounds = array<i64: 8, 32>}, {pipeline_mode = #tpu.pipeline_mode<synchronous>, transform_indices = @transform_3, window_bounds = array<i64: 48, 32>}, {pipeline_mode = #tpu.pipeline_mode<synchronous>, transform_indices = @transform_4, window_bounds = array<i64: 4, 32>}, {pipeline_mode = #tpu.pipeline_mode<synchronous>, transform_indices = @transform_5, window_bounds = array<i64: 8, 1>}, {pipeline_mode = #tpu.pipeline_mode<synchronous>, transform_indices = @transform_6, window_bounds = array<i64: 8, 32>}]} {
    %c0_i32 = arith.constant 0 : i32
    %0 = arith.cmpi eq, %arg0, %c0_i32 : i32
    %1 = arith.extui %0 : i1 to i32
    %c0_i32_0 = arith.constant 0 : i32
    %2 = arith.cmpi ne, %1, %c0_i32_0 : i32
    scf.if %2 {
      %c0_25 = arith.constant 0 : index
      %c0_26 = arith.constant 0 : index
      %41 = vector.load %arg3[%c0_25, %c0_26] : memref<8x32xf32, #tpu.memory_space<vmem>>, vector<8x32xf32>
      %c0_27 = arith.constant 0 : index
      %c0_28 = arith.constant 0 : index
      %42 = vector.load %arg7[%c0_27, %c0_28] : memref<8x32xf32, #tpu.memory_space<vmem>>, vector<8x32xf32>
      tpu.vector_store %arg7[%c0_27, %c0_28], %41 {strides = array<i32>} : memref<8x32xf32, #tpu.memory_space<vmem>>, vector<8x32xf32>,
      %cst_29 = arith.constant 0.000000e+00 : f32
      %43 = vector.broadcast %cst_29 : f32 to vector<8x1xf32>
      %c0_30 = arith.constant 0 : index
      %c0_31 = arith.constant 0 : index
      %44 = vector.load %arg6[%c0_30, %c0_31] : memref<8x1xf32, #tpu.memory_space<vmem>>, vector<8x1xf32>
      tpu.vector_store %arg6[%c0_30, %c0_31], %43 {strides = array<i32>} : memref<8x1xf32, #tpu.memory_space<vmem>>, vector<8x1xf32>,
    } else {
    }
    %c0 = arith.constant 0 : index
    %c0_1 = arith.constant 0 : index
    %c0_2 = arith.constant 0 : index
    %3 = vector.load %arg1[%c0, %c0_1, %c0_2] : memref<1x8x16xf32, #tpu.memory_space<vmem>>, vector<1x8x16xf32>
    %4 = vector.shape_cast %3 : vector<1x8x16xf32> to vector<8x16xf32>
    %c0_3 = arith.constant 0 : index
    %c0_4 = arith.constant 0 : index
    %c0_5 = arith.constant 0 : index
    %5 = vector.load %arg2[%c0_3, %c0_4, %c0_5] : memref<1x8x1xf32, #tpu.memory_space<vmem>>, vector<1x8x1xf32>
    %6 = vector.shape_cast %5 : vector<1x8x1xf32> to vector<8x1xf32>
    %c0_6 = arith.constant 0 : index
    %c0_7 = arith.constant 0 : index
    %7 = vector.load %arg7[%c0_6, %c0_7] : memref<8x32xf32, #tpu.memory_space<vmem>>, vector<8x32xf32>
    %c0_8 = arith.constant 0 : index
    %c0_9 = arith.constant 0 : index
    %8 = vector.load %arg4[%c0_8, %c0_9] : memref<48x32xf32, #tpu.memory_space<vmem>>, vector<32x32xf32>
    %c32 = arith.constant 32 : index
    %c0_10 = arith.constant 0 : index
    %9 = vector.load %arg4[%c32, %c0_10] : memref<48x32xf32, #tpu.memory_space<vmem>>, vector<16x32xf32>
    %c0_11 = arith.constant 0 : index
    %c0_12 = arith.constant 0 : index
    %10 = vector.load %arg5[%c0_11, %c0_12] : memref<4x32xf32, #tpu.memory_space<vmem>>, vector<1x32xf32>
    %c1 = arith.constant 1 : index
    %c0_13 = arith.constant 0 : index
    %11 = vector.load %arg5[%c1, %c0_13] : memref<4x32xf32, #tpu.memory_space<vmem>>, vector<1x32xf32>
    %c2 = arith.constant 2 : index
    %c0_14 = arith.constant 0 : index
    %12 = vector.load %arg5[%c2, %c0_14] : memref<4x32xf32, #tpu.memory_space<vmem>>, vector<1x32xf32>
    %c3 = arith.constant 3 : index
    %c0_15 = arith.constant 0 : index
    %13 = vector.load %arg5[%c3, %c0_15] : memref<4x32xf32, #tpu.memory_space<vmem>>, vector<1x1xf32>
    %cst = arith.constant dense<0.000000e+00> : vector<8x32xf32>
    %14 = tpu.matmul %7, %8, %cst {dimension_numbers = #tpu.dot_dimension_numbers<[1], [0], [0], [1], [0, 0, 1, 1], [], []>} : vector<8x32xf32>, vector<32x32xf32>, vector<8x32xf32> -> vector<8x32xf32>
    %cst_16 = arith.constant dense<0.000000e+00> : vector<8x32xf32>
    %15 = tpu.matmul %4, %9, %cst_16 {dimension_numbers = #tpu.dot_dimension_numbers<[1], [0], [0], [1], [0, 0, 1, 1], [], []>} : vector<8x16xf32>, vector<16x32xf32>, vector<8x32xf32> -> vector<8x32xf32>
    %16 = vector.broadcast %11 : vector<1x32xf32> to vector<8x32xf32>
    %17 = arith.addf %15, %16 : vector<8x32xf32>
    %18 = vector.broadcast %10 : vector<1x32xf32> to vector<8x32xf32>
    %19 = vector.broadcast %6 : vector<8x1xf32> to vector<8x32xf32>
    %20 = arith.mulf %18, %19 : vector<8x32xf32>
    %21 = arith.addf %14, %20 : vector<8x32xf32>
    %22 = arith.addf %21, %17 : vector<8x32xf32>
    %23 = vector.broadcast %12 : vector<1x32xf32> to vector<8x32xf32>
    %24 = arith.mulf %22, %23 : vector<8x32xf32>
    %cst_17 = arith.constant dense<0.000000e+00> : vector<8xf32>
    %25 = vector.multi_reduction <add>, %24, %cst_17 [1] : vector<8x32xf32> to vector<8xf32>
    %26 = vector.shape_cast %25 : vector<8xf32> to vector<8x1xf32>
    %27 = vector.broadcast %13 : vector<1x1xf32> to vector<8x1xf32>
    %28 = arith.addf %26, %27 : vector<8x1xf32>
    %29 = arith.negf %28 : vector<8x1xf32>
    %30 = math.exp %29 : vector<8x1xf32>
    %cst_18 = arith.constant 1.000000e+00 : f32
    %31 = vector.broadcast %cst_18 : f32 to vector<8x1xf32>
    %32 = arith.addf %31, %30 : vector<8x1xf32>
    %33 = arith.divf %31, %32 : vector<8x1xf32>
    %c0_19 = arith.constant 0 : index
    %c0_20 = arith.constant 0 : index
    %34 = vector.load %arg7[%c0_19, %c0_20] : memref<8x32xf32, #tpu.memory_space<vmem>>, vector<8x32xf32>
    tpu.vector_store %arg7[%c0_19, %c0_20], %22 {strides = array<i32>} : memref<8x32xf32, #tpu.memory_space<vmem>>, vector<8x32xf32>,
    %35 = tpu.iota {dimensions = array<i32: 1>} : vector<8x1xi32>
    %36 = vector.broadcast %arg0 : i32 to vector<8x1xi32>
    %37 = arith.cmpi eq, %35, %36 : vector<8x1xi32>
    %c0_21 = arith.constant 0 : index
    %c0_22 = arith.constant 0 : index
    %38 = vector.load %arg6[%c0_21, %c0_22] : memref<8x1xf32, #tpu.memory_space<vmem>>, vector<8x1xf32>
    %39 = arith.select %37, %33, %38 : vector<8x1xi1>, vector<8x1xf32>
    %c0_23 = arith.constant 0 : index
    %c0_24 = arith.constant 0 : index
    %40 = vector.load %arg6[%c0_23, %c0_24] : memref<8x1xf32, #tpu.memory_space<vmem>>, vector<8x1xf32>
    tpu.vector_store %arg6[%c0_23, %c0_24], %39 {strides = array<i32>} : memref<8x1xf32, #tpu.memory_space<vmem>>, vector<8x1xf32>,
    return
  }
  func.func @transform_0(%arg0: i32) -> (i32, i32, i32) {
    %c0_i32 = arith.constant 0 : i32
    %c0_i32_0 = arith.constant 0 : i32
    %c0_i32_1 = arith.constant 0 : i32
    return %arg0, %c0_i32, %c0_i32_0 : i32, i32, i32
  }
  func.func @transform_1(%arg0: i32) -> (i32, i32, i32) {
    %c0_i32 = arith.constant 0 : i32
    %c0_i32_0 = arith.constant 0 : i32
    %c0_i32_1 = arith.constant 0 : i32
    return %arg0, %c0_i32, %c0_i32_0 : i32, i32, i32
  }
  func.func @transform_2(%arg0: i32) -> (i32, i32) {
    %c0_i32 = arith.constant 0 : i32
    %c0_i32_0 = arith.constant 0 : i32
    %c0_i32_1 = arith.constant 0 : i32
    return %c0_i32, %c0_i32_0 : i32, i32
  }
  func.func @transform_3(%arg0: i32) -> (i32, i32) {
    %c0_i32 = arith.constant 0 : i32
    %c0_i32_0 = arith.constant 0 : i32
    %c0_i32_1 = arith.constant 0 : i32
    return %c0_i32, %c0_i32_0 : i32, i32
  }
  func.func @transform_4(%arg0: i32) -> (i32, i32) {
    %c0_i32 = arith.constant 0 : i32
    %c0_i32_0 = arith.constant 0 : i32
    %c0_i32_1 = arith.constant 0 : i32
    return %c0_i32, %c0_i32_0 : i32, i32
  }
  func.func @transform_5(%arg0: i32) -> (i32, i32) {
    %c0_i32 = arith.constant 0 : i32
    %c0_i32_0 = arith.constant 0 : i32
    %c0_i32_1 = arith.constant 0 : i32
    return %c0_i32, %c0_i32_0 : i32, i32
  }
  func.func @transform_6(%arg0: i32) -> (i32, i32) {
    %c0_i32 = arith.constant 0 : i32
    %c0_i32_0 = arith.constant 0 : i32
    %c0_i32_1 = arith.constant 0 : i32
    return %c0_i32, %c0_i32_0 : i32, i32
  }
}

</mosaic_0001>

<bundles_post_ra>
// kernel: tpu_custom_call.1
= control target key start
LH: loop header
LB: loop body
LE: loop exit
PB: predicated region body
PF: predicated region fallthrough
CT: control target
= control target key end

     0   :  { %vm30_vm0 = vcmask 7168   ;;  %v333_v3 = vmov 0.0|0.0   ;;  %v334_v6 = vmov 0.0   ;;  %vm28_vm1 = vcmask 261120   ;;  %s439_s0 = inlined_call_operand.vmem [shape: f32[1,8,16], index: 0, kind: input, shape index: {}]   ;;  %s440_s1 = inlined_call_operand.vmem [shape: f32[1,8,1], index: 1, kind: input, shape index: {}]   ;;  %s441_s2 = inlined_call_operand.vmem [shape: f32[8,32], index: 2, kind: input, shape index: {}]   ;;  %s442_s3 = inlined_call_operand.vmem [shape: f32[48,32], index: 3, kind: input, shape index: {}]   ;;  %s443_s4 = inlined_call_operand.vmem [shape: f32[4,32], index: 4, kind: input, shape index: {}]   ;;  %s444_s5 = inlined_call_operand.vmem [shape: f32[8,1], index: 5, kind: output, shape index: {0}]   ;;  %s445_s6 = inlined_call_operand.hbm [shape: f32[8,32], index: 6, kind: output, shape index: {1}]  }
   0x1   :  { %v39_v0 = vld [vmem:[%s442_s3 + $0x20] sm:$0xff]  ;;  %v40_v1 = vld [vmem:[%s442_s3 + $0x28] sm:$0xff]  ;;  %287 = vmatprep.subr.bf16.mxu1 %v333_v3  ;;  %290 = vmatprep.subr.bf16.mxu0 %v333_v3  ;;  %31 = vst.msk [vmem:[%s444_s5] sm:$0xff] %vm30_vm0, %v334_v6  ;;  %v37_v7 = vld [vmem:[%s442_s3 + $0x10] sm:$0xff]  ;;  %vm335_vm2 = vmmov 0   ;;  %vm49_vm3 = vcmask 130048  }
   0x2   :  { %v35_v2 = vld [vmem:[%s442_s3] sm:$0xff]  ;;  %v288_v4 = vpack.c.bf16 %v40_v1, %v39_v0  ;;  %v36_v5 = vld [vmem:[%s442_s3 + $0x8] sm:$0xff]  ;;  %273 = vmatprep.mubr.msk.f32.mxu1 %vm335_vm2, %v334_v6  ;;  %v38_v9 = vld [vmem:[%s442_s3 + $0x18] sm:$0xff]  ;;  %284 = vmatprep.mubr.msk.f32.mxu0 %vm335_vm2, %v334_v6  ;;  %v336_v13 = vmov 0  }
   0x3   :  { %v291_v8 = vpack.c.bf16 %v36_v5, %v35_v2  ;;  %v27_v10 = vld [vmem:[%s441_s2] sm:$0xff]  ;;  %304 = vset.pattern.permute.xlu0 %v336_v13 }
   0x4   :  { %v33_v11 = vld [vmem:[%s440_s1] sm:$0xff]  ;;  %289 = vmatpush3.bf16.msra.mxu1 %v288_v4  ;;  %29 = vst.msk [vmem:[#allocation2] sm:$0xff] %vm28_vm1, %v27_v10 }
   0x5   :  { %v32_v12 = vld [vmem:[%s439_s0] sm:$0xff] }
   0x6   :  { %12 = vsyncpa [#allocation3], 0  ;;  %292 = vmatpush3.bf16.msra.mxu0 %v291_v8  ;;  %v294_v14 = vpack.c.bf16 %v38_v9, %v37_v7  ;;  %129 = vperm.xlu0 %304, %v33_v11   ;;  %v256_v16 = vld [vmem:[%s443_s4] ss:$0 sm:$0xff]  ;;  %v254_v18 = vld [vmem:[%s443_s4 + $0x1] ss:$0 sm:$0xff] }
   0x7   :  { %293 = vmatprep.subr.bf16.mxu0 %v333_v3  ;;  %274 = vmatmul.mubr.msk.f32.vlgmr.msra.gmra.mrb[0].mxu1 %vm49_vm3, %v32_v12  ;;  %v258_v25 = vld [vmem:[%s443_s4 + $0x2] ss:$0 sm:$0xff]  ;;  %s337_s19 = smov [#allocation2]  }
   0x8   :  { %s244_s20 = sshll.u32 %s337_s19, 4  ;;  %s245_s20 = int_to_ptr.vmem [resolvable:$true] %s244_s20 }
   0x9   :  { %s309_s21 = scalar_lea.vmem %s245_s20, 128  ;;  %p314_p1 = scmp.lt.s32.totalorder %s245_s20, %s245_s20 }
   0xa   :  { %295 = vmatpush3.bf16.msra.mxu0 %v294_v14  ;;  %p310_p0 = scmp.ne.s32.totalorder %s245_s20, %s309_s21  ;;  %p315_p2 = scmp.lt.s32.totalorder %s309_s21, %s309_s21 }
   0xb   :  { %v34_v15 = vld [vmem:[#allocation2] sm:$0xff] }
   0xc   :  { %p316_p3 = por %p315_p2, %p314_p1 }
   0xd   :  { %285 = vmatmul.mubr.msk.f32.vlgmr.msra.gmra.mrb[0].mxu0 %vm28_vm1, %v34_v15 }
   0xe   :  { %p317_p4 = pnand %p316_p3, %p310_p0 }
  0x85   :  { %v130_v17 = vpop.permute.xlu0 %129 }
  0x86   :  { %v132_v19 = vmul.f32 %v256_v16, %v130_v17 }
  0xda   :  { %v119_v20 = vpop.f32.mrb[0].mxu1 }
  0xdb   :  { %v120_v21 = vadd.f32 %v254_v18, %v119_v20  ;;  %v275_v22 = vpop.f32.mrb[1].mxu1 }
  0xdd   :  { %v297_v23 = vadd.f32 %v132_v19, %v120_v21 }
  0xe0   :  { %v203_v24 = vpop.f32.mrb[0].mxu0 }
  0xe1   :  { %v298_v26 = vadd.f32 %v297_v23, %v203_v24  ;;  %v286_v27 = vpop.f32.mrb[1].mxu0 }
  0xe3   :  { %227 = vst.msk [vmem:[#allocation2] sm:$0xff] %vm28_vm1, %v298_v26  ;;  %v212_v28 = vmul.f32 %v298_v26, %v258_v25 }
  0xe5   :  { %v213_v29 = vsel %vm28_vm1, %v212_v28, 0.0 }
  0xe6   :  { %214 = vadd.xlane.f32.xlu0 %v213_v29 }
  0xe7   :  { %320 = shalt.err (!%p317_p4)
}
  0xe8   :  { %s321_s24 = scalar_lea.hbm %s445_s6, 128 }
  0xe9   :  { %p322_p5 = scmp.ne.s32.totalorder %s445_s6, %s321_s24  ;;  %p325_p6 = scmp.lt.u32.totalorder %s321_s24, %s445_s6 }
  0xeb   :  { %p327_p7 = pnand %p325_p6, %p322_p5 }
  0xed   :  { %330 = shalt.err (!%p327_p7)
}
  0xee   :  { %247 = dma.vmem_to_hbm [thread:$0]  %s245_s20, 128, %s445_s6, [#allocation3]   ;;  %v259_v30 = vld [vmem:[%s443_s4 + $0x3] ss:$0 sm:$0xff]  ;;  %v228_v36 = vlaneseq }
  0xef   :  { %v232_v38 = vld [vmem:[%s444_s5] sm:$0xff] }
  0xf0   :  { %v229_v37 = vand.u32 127, %v228_v36 }
  0xf2   :  { %vm231_vm4 = vcmp.eq.s32.totalorder %v229_v37, 0 }
 0x173   :  { %v215_v31 = vpop.xlane.xlu0 %214 }
 0x174   :  { %v220_v32 = vadd.f32 %v259_v30, %v215_v31 }
 0x176   :  { %v260_v33 = vmul.f32 -1.442695, %v220_v32 }
 0x178   :  { %305 = vpow2.f32 %v260_v33 }
 0x182   :  { %v306_v34 = vpop.eup %305 }
 0x183   :  { %v224_v35 = vadd.f32 1.0, %v306_v34 }
 0x185   :  { %307 = vrcp.f32 %v224_v35 }
 0x18f   :  { %v308_v39 = vpop.eup %307 }
 0x190   :  { %v233_v40 = vsel %vm231_vm4, %v308_v39, %v232_v38 }
 0x191   :  { %235 = vst.msk [vmem:[%s444_s5] sm:$0xff] %vm30_vm0, %v233_v40 }
 0x192   :  { %331 = dma.done.wait [#allocation3], 128  }
 0x193   :  { %332 = vsyncadd [#allocation3], 4294967168 }
 0x194   :  { %253 = vsyncpa [#allocation3], 1 }

</bundles_post_ra>
